<compile_context>
chip_gen: v7x
topology: tpu7x:2x2x1
jax: 0.10.0
libtpu: 0.0.40
codegen_flags: <defaults>
</compile_context>

<pallas_src>
import jax
import jax.numpy as jnp
from jax.experimental import pallas as pl
from jax.experimental.pallas import tpu as pltpu

HIDDEN = 10
INPUT_SIZE = 1


def rnn_seq_kernel(x_ref, h0_ref, wih_ref, whh_ref, b_ref, wout_ref, bout_ref,
                   out_ref, hn_ref, buf_ref):
    """Whole-sequence Elman RNN + per-timestep Linear in a single invocation.

    x_ref    : (S, B, 1)   time-major input
    h0_ref   : (B, H)      initial hidden state
    wih_ref  : (1, H)      W_ih^T
    whh_ref  : (H, H)      W_hh^T
    b_ref    : (1, H)      b_ih + b_hh
    wout_ref : (1, H)      Linear(10,1).weight (already a row)
    bout_ref : (1, 1)      Linear(10,1).bias
    out_ref  : (S, B)      per-timestep output (feature dim squeezed)
    hn_ref   : (B, H)      final hidden state
    buf_ref  : (S, B, H)   VMEM scratch: holds ih[t], overwritten with h[t]
    """
    S, B, _ = x_ref.shape

    # 1) Input contribution for ALL timesteps, vectorized (off the serial
    #    chain):  buf[s, b, :] = x[s, b, 0] * W_ih^T + (b_ih + b_hh)
    buf_ref[...] = x_ref[...] * wih_ref[...][None] + b_ref[...][None]

    # 2) Serial recurrence.  Hidden state is a loop-carried value (stays in
    #    vregs); the per-step critical path is only  dot -> add -> tanh.
    whh = whh_ref[...]                         # weights read once, kept in vregs

    def step(t, h):
        h_new = jnp.tanh(buf_ref[t]
                         + jnp.dot(h, whh, preferred_element_type=jnp.float32))
        buf_ref[t] = h_new                     # stash; not on the carried path
        return h_new

    h_last = jax.lax.fori_loop(0, S, step, h0_ref[...],
                               unroll=True if S <= 32 else 8)
    hn_ref[...] = h_last

    # 3) Output projection hoisted out of the recurrence, applied to all
    #    timesteps at once:  y[s, b] = sum_h h[s, b, h] * W_out[h] + b_out
    y = jnp.sum(buf_ref[...] * wout_ref[...][None], axis=-1)      # (S, B)
    out_ref[...] = (y + bout_ref[...]).astype(out_ref.dtype)


def rnn_timer_forward(x_bsf, params, h0=None):
    """x_bsf: (B, S, 1) float32 (batch_first, like PyTorch).

    Returns (out, h_n) with out: (B, S, 1) and h_n: (1, B, H) (PyTorch layout).
    Pass h_n back in as h0 to reproduce the module's eval-mode forward.
    """
    B, S, F = x_bsf.shape
    assert F == INPUT_SIZE
    x_sbf = jnp.transpose(x_bsf, (1, 0, 2))       # (S, B, 1) time-major

    if h0 is None:
        h0_bh = jnp.zeros((B, HIDDEN), jnp.float32)   # training-mode: rnn(x, None)
    else:
        h0_bh = jnp.asarray(h0, jnp.float32).reshape(B, HIDDEN)

    wih_t = params["w_ih"].T                      # (1, H)
    whh_t = params["w_hh"].T                      # (H, H)
    b = (params["b_ih"] + params["b_hh"])[None]   # (1, H)
    wout_row = params["w_out"]                    # (1, H) — Linear weight is (1, H)
    bout = params["b_out"][None]                  # (1, 1)

    grid_spec = pltpu.PrefetchScalarGridSpec(
        num_scalar_prefetch=0,
        grid=(1,),                                # single invocation; the time
        in_specs=[                                # loop lives inside the kernel
            pl.BlockSpec((S, B, INPUT_SIZE), lambda i: (0, 0, 0)),
            pl.BlockSpec((B, HIDDEN), lambda i: (0, 0)),
            pl.BlockSpec((INPUT_SIZE, HIDDEN), lambda i: (0, 0)),
            pl.BlockSpec((HIDDEN, HIDDEN), lambda i: (0, 0)),
            pl.BlockSpec((1, HIDDEN), lambda i: (0, 0)),
            pl.BlockSpec((1, HIDDEN), lambda i: (0, 0)),
            pl.BlockSpec((1, 1), lambda i: (0, 0)),
        ],
        out_specs=[
            pl.BlockSpec((S, B), lambda i: (0, 0)),
            pl.BlockSpec((B, HIDDEN), lambda i: (0, 0)),
        ],
        scratch_shapes=[
            pltpu.VMEM((S, B, HIDDEN), jnp.float32),   # ih / h, reused
        ],
    )

    out_sb, h_n = pl.pallas_call(
        rnn_seq_kernel,
        out_shape=(
            jax.ShapeDtypeStruct((S, B), jnp.float32),
            jax.ShapeDtypeStruct((B, HIDDEN), jnp.float32),
        ),
        grid_spec=grid_spec,
        compiler_params=pltpu.CompilerParams(
            dimension_semantics=("arbitrary",)),
    )(x_sbf, h0_bh, wih_t, whh_t, b, wout_row, bout)

    # TODO(synk): the PyTorch module stores h_n as a module attribute; here the
    # caller must carry h_n between calls for the eval-mode forward.
    return jnp.transpose(out_sb)[..., None], h_n[None]   # (B,S,1), (1,B,H)


def reference_forward(x_bsf, params):
    """Pure-JAX reference of nn.RNN(1,10,1,batch_first) + Linear(10,1)."""
    def step(h, x_t):
        h_new = jnp.tanh(x_t @ params["w_ih"].T + params["b_ih"]
                         + h @ params["w_hh"].T + params["b_hh"])
        return h_new, h_new

    B, S, _ = x_bsf.shape
    h0 = jnp.zeros((B, HIDDEN), jnp.float32)
    h_last, hs = jax.lax.scan(step, h0, jnp.transpose(x_bsf, (1, 0, 2)))  # (S,B,H)
    r_out = jnp.transpose(hs, (1, 0, 2))                                   # (B,S,H)
    return r_out @ params["w_out"].T + params["b_out"], h_last[None]


def init_params(key):
    """Deterministic init matching PyTorch shapes: U(-1/sqrt(H), 1/sqrt(H))."""
    bound = 1.0 / jnp.sqrt(jnp.float32(HIDDEN))
    ks = jax.random.split(key, 6)
    u = lambda k, shape: jax.random.uniform(k, shape, jnp.float32, -bound, bound)
    return {
        "w_ih": u(ks[0], (HIDDEN, INPUT_SIZE)),   # weight_ih_l0
        "w_hh": u(ks[1], (HIDDEN, HIDDEN)),       # weight_hh_l0
        "b_ih": u(ks[2], (HIDDEN,)),              # bias_ih_l0
        "b_hh": u(ks[3], (HIDDEN,)),              # bias_hh_l0
        "w_out": u(ks[4], (1, HIDDEN)),           # Linear(10,1).weight
        "b_out": u(ks[5], (1,)),                  # Linear(10,1).bias
    }


if __name__ == "__main__":
    key = jax.random.PRNGKey(0)
    k_x, k_p = jax.random.split(key)

    B, S = 2, 8
    x = jax.random.normal(k_x, (B, S, INPUT_SIZE), jnp.float32)
    params = init_params(k_p)

    out, h_n = rnn_timer_forward(x, params)       # training-mode forward (h0 = 0)
    out = jax.block_until_ready(out)
    h_n = jax.block_until_ready(h_n)

    ref_out, ref_hn = reference_forward(x, params)
    assert out.shape == (B, S, 1)
    assert h_n.shape == (1, B, HIDDEN)
    assert jnp.allclose(out, ref_out, atol=1e-5, rtol=1e-5), "out mismatch vs reference"
    assert jnp.allclose(h_n, ref_hn, atol=1e-5, rtol=1e-5), "h_n mismatch vs reference"

    print("KERNEL_OK")
</pallas_src>

<mosaic_0001>
module attributes {stable_mosaic.version = 11 : i64} {
  func.func @rnn_seq_kernel(%arg0: i32, %arg1: memref<8x2x1xf32, #tpu.memory_space<vmem>>, %arg2: memref<2x10xf32, #tpu.memory_space<vmem>>, %arg3: memref<1x10xf32, #tpu.memory_space<vmem>>, %arg4: memref<10x10xf32, #tpu.memory_space<vmem>>, %arg5: memref<1x10xf32, #tpu.memory_space<vmem>>, %arg6: memref<1x10xf32, #tpu.memory_space<vmem>>, %arg7: memref<1x1xf32, #tpu.memory_space<vmem>>, %arg8: memref<8x2xf32, #tpu.memory_space<vmem>>, %arg9: memref<2x10xf32, #tpu.memory_space<vmem>>, %arg10: memref<8x2x10xf32, #tpu.memory_space<vmem>>) attributes {dimension_semantics = [#tpu.dimension_semantics<arbitrary>], iteration_bounds = array<i64: 1>, scalar_prefetch = 0 : i64, scratch_operands = 1 : i64, tpu.core_type = #tpu.core_type<tc>, window_params = [{pipeline_mode = #tpu.pipeline_mode<synchronous>, transform_indices = @transform_0, window_bounds = array<i64: 8, 2, 1>}, {pipeline_mode = #tpu.pipeline_mode<synchronous>, transform_indices = @transform_1, window_bounds = array<i64: 2, 10>}, {pipeline_mode = #tpu.pipeline_mode<synchronous>, transform_indices = @transform_2, window_bounds = array<i64: 1, 10>}, {pipeline_mode = #tpu.pipeline_mode<synchronous>, transform_indices = @transform_3, window_bounds = array<i64: 10, 10>}, {pipeline_mode = #tpu.pipeline_mode<synchronous>, transform_indices = @transform_4, window_bounds = array<i64: 1, 10>}, {pipeline_mode = #tpu.pipeline_mode<synchronous>, transform_indices = @transform_5, window_bounds = array<i64: 1, 10>}, {pipeline_mode = #tpu.pipeline_mode<synchronous>, transform_indices = @transform_6, window_bounds = array<i64: 1, 1>}, {pipeline_mode = #tpu.pipeline_mode<synchronous>, transform_indices = @transform_7, window_bounds = array<i64: 8, 2>}, {pipeline_mode = #tpu.pipeline_mode<synchronous>, transform_indices = @transform_8, window_bounds = array<i64: 2, 10>}]} {
    %c0 = arith.constant 0 : index
    %c0_0 = arith.constant 0 : index
    %c0_1 = arith.constant 0 : index
    %0 = vector.load %arg1[%c0, %c0_0, %c0_1] : memref<8x2x1xf32, #tpu.memory_space<vmem>>, vector<8x2x1xf32>
    %c0_2 = arith.constant 0 : index
    %c0_3 = arith.constant 0 : index
    %1 = vector.load %arg3[%c0_2, %c0_3] : memref<1x10xf32, #tpu.memory_space<vmem>>, vector<1x10xf32>
    %2 = vector.shape_cast %1 : vector<1x10xf32> to vector<1x1x10xf32>
    %3 = vector.broadcast %0 : vector<8x2x1xf32> to vector<8x2x10xf32>
    %4 = vector.broadcast %2 : vector<1x1x10xf32> to vector<8x2x10xf32>
    %5 = arith.mulf %3, %4 : vector<8x2x10xf32>
    %c0_4 = arith.constant 0 : index
    %c0_5 = arith.constant 0 : index
    %6 = vector.load %arg5[%c0_4, %c0_5] : memref<1x10xf32, #tpu.memory_space<vmem>>, vector<1x10xf32>
    %7 = vector.shape_cast %6 : vector<1x10xf32> to vector<1x1x10xf32>
    %8 = vector.broadcast %7 : vector<1x1x10xf32> to vector<8x2x10xf32>
    %9 = arith.addf %5, %8 : vector<8x2x10xf32>
    %c0_6 = arith.constant 0 : index
    %c0_7 = arith.constant 0 : index
    %c0_8 = arith.constant 0 : index
    %10 = vector.load %arg10[%c0_6, %c0_7, %c0_8] : memref<8x2x10xf32, #tpu.memory_space<vmem>>, vector<8x2x10xf32>
    tpu.vector_store %arg10[%c0_6, %c0_7, %c0_8], %9 {strides = array<i32>} : memref<8x2x10xf32, #tpu.memory_space<vmem>>, vector<8x2x10xf32>,
    %c0_9 = arith.constant 0 : index
    %c0_10 = arith.constant 0 : index
    %11 = vector.load %arg4[%c0_9, %c0_10] : memref<10x10xf32, #tpu.memory_space<vmem>>, vector<10x10xf32>
    %c0_11 = arith.constant 0 : index
    %c0_12 = arith.constant 0 : index
    %12 = vector.load %arg2[%c0_11, %c0_12] : memref<2x10xf32, #tpu.memory_space<vmem>>, vector<2x10xf32>
    %c0_i32 = arith.constant 0 : i32
    %13 = arith.index_cast %c0_i32 : i32 to index
    %c0_13 = arith.constant 0 : index
    %c0_14 = arith.constant 0 : index
    %14 = vector.load %arg10[%13, %c0_13, %c0_14] : memref<8x2x10xf32, #tpu.memory_space<vmem>>, vector<1x2x10xf32>
    %15 = vector.shape_cast %14 : vector<1x2x10xf32> to vector<2x10xf32>
    %cst = arith.constant dense<0.000000e+00> : vector<2x10xf32>
    %16 = tpu.matmul %12, %11, %cst {dimension_numbers = #tpu.dot_dimension_numbers<[1], [0], [0], [1], [0, 0, 1, 1], [], []>} : vector<2x10xf32>, vector<10x10xf32>, vector<2x10xf32> -> vector<2x10xf32>
    %17 = arith.addf %15, %16 : vector<2x10xf32>
    %18 = math.tanh %17 : vector<2x10xf32>
    %19 = arith.index_cast %c0_i32 : i32 to index
    %c0_15 = arith.constant 0 : index
    %c0_16 = arith.constant 0 : index
    %20 = vector.load %arg10[%19, %c0_15, %c0_16] : memref<8x2x10xf32, #tpu.memory_space<vmem>>, vector<1x2x10xf32>
    %21 = vector.shape_cast %20 : vector<1x2x10xf32> to vector<2x10xf32>
    %22 = vector.shape_cast %18 : vector<2x10xf32> to vector<1x2x10xf32>
    tpu.vector_store %arg10[%19, %c0_15, %c0_16], %22 {strides = array<i32>} : memref<8x2x10xf32, #tpu.memory_space<vmem>>, vector<1x2x10xf32>,
    %c1_i32 = arith.constant 1 : i32
    %23 = arith.index_cast %c1_i32 : i32 to index
    %c0_17 = arith.constant 0 : index
    %c0_18 = arith.constant 0 : index
    %24 = vector.load %arg10[%23, %c0_17, %c0_18] : memref<8x2x10xf32, #tpu.memory_space<vmem>>, vector<1x2x10xf32>
    %25 = vector.shape_cast %24 : vector<1x2x10xf32> to vector<2x10xf32>
    %cst_19 = arith.constant dense<0.000000e+00> : vector<2x10xf32>
    %26 = tpu.matmul %18, %11, %cst_19 {dimension_numbers = #tpu.dot_dimension_numbers<[1], [0], [0], [1], [0, 0, 1, 1], [], []>} : vector<2x10xf32>, vector<10x10xf32>, vector<2x10xf32> -> vector<2x10xf32>
    %27 = arith.addf %25, %26 : vector<2x10xf32>
    %28 = math.tanh %27 : vector<2x10xf32>
    %29 = arith.index_cast %c1_i32 : i32 to index
    %c0_20 = arith.constant 0 : index
    %c0_21 = arith.constant 0 : index
    %30 = vector.load %arg10[%29, %c0_20, %c0_21] : memref<8x2x10xf32, #tpu.memory_space<vmem>>, vector<1x2x10xf32>
    %31 = vector.shape_cast %30 : vector<1x2x10xf32> to vector<2x10xf32>
    %32 = vector.shape_cast %28 : vector<2x10xf32> to vector<1x2x10xf32>
    tpu.vector_store %arg10[%29, %c0_20, %c0_21], %32 {strides = array<i32>} : memref<8x2x10xf32, #tpu.memory_space<vmem>>, vector<1x2x10xf32>,
    %c2_i32 = arith.constant 2 : i32
    %33 = arith.index_cast %c2_i32 : i32 to index
    %c0_22 = arith.constant 0 : index
    %c0_23 = arith.constant 0 : index
    %34 = vector.load %arg10[%33, %c0_22, %c0_23] : memref<8x2x10xf32, #tpu.memory_space<vmem>>, vector<1x2x10xf32>
    %35 = vector.shape_cast %34 : vector<1x2x10xf32> to vector<2x10xf32>
    %cst_24 = arith.constant dense<0.000000e+00> : vector<2x10xf32>
    %36 = tpu.matmul %28, %11, %cst_24 {dimension_numbers = #tpu.dot_dimension_numbers<[1], [0], [0], [1], [0, 0, 1, 1], [], []>} : vector<2x10xf32>, vector<10x10xf32>, vector<2x10xf32> -> vector<2x10xf32>
    %37 = arith.addf %35, %36 : vector<2x10xf32>
    %38 = math.tanh %37 : vector<2x10xf32>
    %39 = arith.index_cast %c2_i32 : i32 to index
    %c0_25 = arith.constant 0 : index
    %c0_26 = arith.constant 0 : index
    %40 = vector.load %arg10[%39, %c0_25, %c0_26] : memref<8x2x10xf32, #tpu.memory_space<vmem>>, vector<1x2x10xf32>
    %41 = vector.shape_cast %40 : vector<1x2x10xf32> to vector<2x10xf32>
    %42 = vector.shape_cast %38 : vector<2x10xf32> to vector<1x2x10xf32>
    tpu.vector_store %arg10[%39, %c0_25, %c0_26], %42 {strides = array<i32>} : memref<8x2x10xf32, #tpu.memory_space<vmem>>, vector<1x2x10xf32>,
    %c3_i32 = arith.constant 3 : i32
    %43 = arith.index_cast %c3_i32 : i32 to index
    %c0_27 = arith.constant 0 : index
    %c0_28 = arith.constant 0 : index
    %44 = vector.load %arg10[%43, %c0_27, %c0_28] : memref<8x2x10xf32, #tpu.memory_space<vmem>>, vector<1x2x10xf32>
    %45 = vector.shape_cast %44 : vector<1x2x10xf32> to vector<2x10xf32>
    %cst_29 = arith.constant dense<0.000000e+00> : vector<2x10xf32>
    %46 = tpu.matmul %38, %11, %cst_29 {dimension_numbers = #tpu.dot_dimension_numbers<[1], [0], [0], [1], [0, 0, 1, 1], [], []>} : vector<2x10xf32>, vector<10x10xf32>, vector<2x10xf32> -> vector<2x10xf32>
    %47 = arith.addf %45, %46 : vector<2x10xf32>
    %48 = math.tanh %47 : vector<2x10xf32>
    %49 = arith.index_cast %c3_i32 : i32 to index
    %c0_30 = arith.constant 0 : index
    %c0_31 = arith.constant 0 : index
    %50 = vector.load %arg10[%49, %c0_30, %c0_31] : memref<8x2x10xf32, #tpu.memory_space<vmem>>, vector<1x2x10xf32>
    %51 = vector.shape_cast %50 : vector<1x2x10xf32> to vector<2x10xf32>
    %52 = vector.shape_cast %48 : vector<2x10xf32> to vector<1x2x10xf32>
    tpu.vector_store %arg10[%49, %c0_30, %c0_31], %52 {strides = array<i32>} : memref<8x2x10xf32, #tpu.memory_space<vmem>>, vector<1x2x10xf32>,
    %c4_i32 = arith.constant 4 : i32
    %53 = arith.index_cast %c4_i32 : i32 to index
    %c0_32 = arith.constant 0 : index
    %c0_33 = arith.constant 0 : index
    %54 = vector.load %arg10[%53, %c0_32, %c0_33] : memref<8x2x10xf32, #tpu.memory_space<vmem>>, vector<1x2x10xf32>
    %55 = vector.shape_cast %54 : vector<1x2x10xf32> to vector<2x10xf32>
    %cst_34 = arith.constant dense<0.000000e+00> : vector<2x10xf32>
    %56 = tpu.matmul %48, %11, %cst_34 {dimension_numbers = #tpu.dot_dimension_numbers<[1], [0], [0], [1], [0, 0, 1, 1], [], []>} : vector<2x10xf32>, vector<10x10xf32>, vector<2x10xf32> -> vector<2x10xf32>
    %57 = arith.addf %55, %56 : vector<2x10xf32>
    %58 = math.tanh %57 : vector<2x10xf32>
    %59 = arith.index_cast %c4_i32 : i32 to index
    %c0_35 = arith.constant 0 : index
    %c0_36 = arith.constant 0 : index
    %60 = vector.load %arg10[%59, %c0_35, %c0_36] : memref<8x2x10xf32, #tpu.memory_space<vmem>>, vector<1x2x10xf32>
    %61 = vector.shape_cast %60 : vector<1x2x10xf32> to vector<2x10xf32>
    %62 = vector.shape_cast %58 : vector<2x10xf32> to vector<1x2x10xf32>
    tpu.vector_store %arg10[%59, %c0_35, %c0_36], %62 {strides = array<i32>} : memref<8x2x10xf32, #tpu.memory_space<vmem>>, vector<1x2x10xf32>,
    %c5_i32 = arith.constant 5 : i32
    %63 = arith.index_cast %c5_i32 : i32 to index
    %c0_37 = arith.constant 0 : index
    %c0_38 = arith.constant 0 : index
    %64 = vector.load %arg10[%63, %c0_37, %c0_38] : memref<8x2x10xf32, #tpu.memory_space<vmem>>, vector<1x2x10xf32>
    %65 = vector.shape_cast %64 : vector<1x2x10xf32> to vector<2x10xf32>
    %cst_39 = arith.constant dense<0.000000e+00> : vector<2x10xf32>
    %66 = tpu.matmul %58, %11, %cst_39 {dimension_numbers = #tpu.dot_dimension_numbers<[1], [0], [0], [1], [0, 0, 1, 1], [], []>} : vector<2x10xf32>, vector<10x10xf32>, vector<2x10xf32> -> vector<2x10xf32>
    %67 = arith.addf %65, %66 : vector<2x10xf32>
    %68 = math.tanh %67 : vector<2x10xf32>
    %69 = arith.index_cast %c5_i32 : i32 to index
    %c0_40 = arith.constant 0 : index
    %c0_41 = arith.constant 0 : index
    %70 = vector.load %arg10[%69, %c0_40, %c0_41] : memref<8x2x10xf32, #tpu.memory_space<vmem>>, vector<1x2x10xf32>
    %71 = vector.shape_cast %70 : vector<1x2x10xf32> to vector<2x10xf32>
    %72 = vector.shape_cast %68 : vector<2x10xf32> to vector<1x2x10xf32>
    tpu.vector_store %arg10[%69, %c0_40, %c0_41], %72 {strides = array<i32>} : memref<8x2x10xf32, #tpu.memory_space<vmem>>, vector<1x2x10xf32>,
    %c6_i32 = arith.constant 6 : i32
    %73 = arith.index_cast %c6_i32 : i32 to index
    %c0_42 = arith.constant 0 : index
    %c0_43 = arith.constant 0 : index
    %74 = vector.load %arg10[%73, %c0_42, %c0_43] : memref<8x2x10xf32, #tpu.memory_space<vmem>>, vector<1x2x10xf32>
    %75 = vector.shape_cast %74 : vector<1x2x10xf32> to vector<2x10xf32>
    %cst_44 = arith.constant dense<0.000000e+00> : vector<2x10xf32>
    %76 = tpu.matmul %68, %11, %cst_44 {dimension_numbers = #tpu.dot_dimension_numbers<[1], [0], [0], [1], [0, 0, 1, 1], [], []>} : vector<2x10xf32>, vector<10x10xf32>, vector<2x10xf32> -> vector<2x10xf32>
    %77 = arith.addf %75, %76 : vector<2x10xf32>
    %78 = math.tanh %77 : vector<2x10xf32>
    %79 = arith.index_cast %c6_i32 : i32 to index
    %c0_45 = arith.constant 0 : index
    %c0_46 = arith.constant 0 : index
    %80 = vector.load %arg10[%79, %c0_45, %c0_46] : memref<8x2x10xf32, #tpu.memory_space<vmem>>, vector<1x2x10xf32>
    %81 = vector.shape_cast %80 : vector<1x2x10xf32> to vector<2x10xf32>
    %82 = vector.shape_cast %78 : vector<2x10xf32> to vector<1x2x10xf32>
    tpu.vector_store %arg10[%79, %c0_45, %c0_46], %82 {strides = array<i32>} : memref<8x2x10xf32, #tpu.memory_space<vmem>>, vector<1x2x10xf32>,
    %c7_i32 = arith.constant 7 : i32
    %83 = arith.index_cast %c7_i32 : i32 to index
    %c0_47 = arith.constant 0 : index
    %c0_48 = arith.constant 0 : index
    %84 = vector.load %arg10[%83, %c0_47, %c0_48] : memref<8x2x10xf32, #tpu.memory_space<vmem>>, vector<1x2x10xf32>
    %85 = vector.shape_cast %84 : vector<1x2x10xf32> to vector<2x10xf32>
    %cst_49 = arith.constant dense<0.000000e+00> : vector<2x10xf32>
    %86 = tpu.matmul %78, %11, %cst_49 {dimension_numbers = #tpu.dot_dimension_numbers<[1], [0], [0], [1], [0, 0, 1, 1], [], []>} : vector<2x10xf32>, vector<10x10xf32>, vector<2x10xf32> -> vector<2x10xf32>
    %87 = arith.addf %85, %86 : vector<2x10xf32>
    %88 = math.tanh %87 : vector<2x10xf32>
    %89 = arith.index_cast %c7_i32 : i32 to index
    %c0_50 = arith.constant 0 : index
    %c0_51 = arith.constant 0 : index
    %90 = vector.load %arg10[%89, %c0_50, %c0_51] : memref<8x2x10xf32, #tpu.memory_space<vmem>>, vector<1x2x10xf32>
    %91 = vector.shape_cast %90 : vector<1x2x10xf32> to vector<2x10xf32>
    %92 = vector.shape_cast %88 : vector<2x10xf32> to vector<1x2x10xf32>
    tpu.vector_store %arg10[%89, %c0_50, %c0_51], %92 {strides = array<i32>} : memref<8x2x10xf32, #tpu.memory_space<vmem>>, vector<1x2x10xf32>,
    %c8_i32 = arith.constant 8 : i32
    %c0_52 = arith.constant 0 : index
    %c0_53 = arith.constant 0 : index
    %93 = vector.load %arg9[%c0_52, %c0_53] : memref<2x10xf32, #tpu.memory_space<vmem>>, vector<2x10xf32>
    tpu.vector_store %arg9[%c0_52, %c0_53], %88 {strides = array<i32>} : memref<2x10xf32, #tpu.memory_space<vmem>>, vector<2x10xf32>,
    %c0_54 = arith.constant 0 : index
    %c0_55 = arith.constant 0 : index
    %c0_56 = arith.constant 0 : index
    %94 = vector.load %arg10[%c0_54, %c0_55, %c0_56] : memref<8x2x10xf32, #tpu.memory_space<vmem>>, vector<8x2x10xf32>
    %c0_57 = arith.constant 0 : index
    %c0_58 = arith.constant 0 : index
    %95 = vector.load %arg6[%c0_57, %c0_58] : memref<1x10xf32, #tpu.memory_space<vmem>>, vector<1x10xf32>
    %96 = vector.shape_cast %95 : vector<1x10xf32> to vector<1x1x10xf32>
    %97 = vector.broadcast %96 : vector<1x1x10xf32> to vector<8x2x10xf32>
    %98 = arith.mulf %94, %97 : vector<8x2x10xf32>
    %cst_59 = arith.constant dense<0.000000e+00> : vector<8x2xf32>
    %99 = vector.multi_reduction <add>, %98, %cst_59 [2] : vector<8x2x10xf32> to vector<8x2xf32>
    %c0_60 = arith.constant 0 : index
    %c0_61 = arith.constant 0 : index
    %100 = vector.load %arg7[%c0_60, %c0_61] : memref<1x1xf32, #tpu.memory_space<vmem>>, vector<1x1xf32>
    %101 = vector.broadcast %100 : vector<1x1xf32> to vector<8x2xf32>
    %102 = arith.addf %99, %101 : vector<8x2xf32>
    %c0_62 = arith.constant 0 : index
    %c0_63 = arith.constant 0 : index
    %103 = vector.load %arg8[%c0_62, %c0_63] : memref<8x2xf32, #tpu.memory_space<vmem>>, vector<8x2xf32>
    tpu.vector_store %arg8[%c0_62, %c0_63], %102 {strides = array<i32>} : memref<8x2xf32, #tpu.memory_space<vmem>>, vector<8x2xf32>,
    return
  }
  func.func @transform_0(%arg0: i32) -> (i32, i32, i32) {
    %c0_i32 = arith.constant 0 : i32
    %c0_i32_0 = arith.constant 0 : i32
    %c0_i32_1 = arith.constant 0 : i32
    %c0_i32_2 = arith.constant 0 : i32
    return %c0_i32, %c0_i32_0, %c0_i32_1 : i32, i32, i32
  }
  func.func @transform_1(%arg0: i32) -> (i32, i32) {
    %c0_i32 = arith.constant 0 : i32
    %c0_i32_0 = arith.constant 0 : i32
    %c0_i32_1 = arith.constant 0 : i32
    return %c0_i32, %c0_i32_0 : i32, i32
  }
  func.func @transform_2(%arg0: i32) -> (i32, i32) {
    %c0_i32 = arith.constant 0 : i32
    %c0_i32_0 = arith.constant 0 : i32
    %c0_i32_1 = arith.constant 0 : i32
    return %c0_i32, %c0_i32_0 : i32, i32
  }
  func.func @transform_3(%arg0: i32) -> (i32, i32) {
    %c0_i32 = arith.constant 0 : i32
    %c0_i32_0 = arith.constant 0 : i32
    %c0_i32_1 = arith.constant 0 : i32
    return %c0_i32, %c0_i32_0 : i32, i32
  }
  func.func @transform_4(%arg0: i32) -> (i32, i32) {
    %c0_i32 = arith.constant 0 : i32
    %c0_i32_0 = arith.constant 0 : i32
    %c0_i32_1 = arith.constant 0 : i32
    return %c0_i32, %c0_i32_0 : i32, i32
  }
  func.func @transform_5(%arg0: i32) -> (i32, i32) {
    %c0_i32 = arith.constant 0 : i32
    %c0_i32_0 = arith.constant 0 : i32
    %c0_i32_1 = arith.constant 0 : i32
    return %c0_i32, %c0_i32_0 : i32, i32
  }
  func.func @transform_6(%arg0: i32) -> (i32, i32) {
    %c0_i32 = arith.constant 0 : i32
    %c0_i32_0 = arith.constant 0 : i32
    %c0_i32_1 = arith.constant 0 : i32
    return %c0_i32, %c0_i32_0 : i32, i32
  }
  func.func @transform_7(%arg0: i32) -> (i32, i32) {
    %c0_i32 = arith.constant 0 : i32
    %c0_i32_0 = arith.constant 0 : i32
    %c0_i32_1 = arith.constant 0 : i32
    return %c0_i32, %c0_i32_0 : i32, i32
  }
  func.func @transform_8(%arg0: i32) -> (i32, i32) {
    %c0_i32 = arith.constant 0 : i32
    %c0_i32_0 = arith.constant 0 : i32
    %c0_i32_1 = arith.constant 0 : i32
    return %c0_i32, %c0_i32_0 : i32, i32
  }
}

</mosaic_0001>

<bundles_post_ra>
// kernel: tpu_custom_call.1
= control target key start
LH: loop header
LB: loop body
LE: loop exit
PB: predicated region body
PF: predicated region fallthrough
CT: control target
= control target key end

     0   :  { %s1280_s0 = inlined_call_operand.vmem [shape: f32[8,2,1], index: 0, kind: input, shape index: {}]   ;;  %s1281_s1 = inlined_call_operand.vmem [shape: f32[2,10], index: 1, kind: input, shape index: {}]   ;;  %s1282_s2 = inlined_call_operand.vmem [shape: f32[1,10], index: 2, kind: input, shape index: {}]   ;;  %s1283_s3 = inlined_call_operand.vmem [shape: f32[10,10], index: 3, kind: input, shape index: {}]   ;;  %s1284_s4 = inlined_call_operand.vmem [shape: f32[1,10], index: 4, kind: input, shape index: {}]   ;;  %s1285_s5 = inlined_call_operand.vmem [shape: f32[1,10], index: 5, kind: input, shape index: {}]   ;;  %s1286_s6 = inlined_call_operand.<no memory space> [shape: f32[1,1], index: 6, kind: input, shape index: {}]   ;;  %s1287_s7 = inlined_call_operand.vmem [shape: f32[8,2], index: 7, kind: output, shape index: {0}]   ;;  %s1288_s8 = inlined_call_operand.hbm [shape: f32[2,10], index: 8, kind: output, shape index: {1}]  }
   0x1   :  { %v14_v0 = vstv %s1286_s6 }
   0x2   :  { %15 = vst [vmem:[#allocation3] sm:$0x1] %v14_v0 }
   0x3   :  { %v118_v1 = vld [vmem:[%s1283_s3] sm:$0xff]  ;;  %v119_v2 = vld [vmem:[%s1283_s3 + $0x8] sm:$0x3]  ;;  %vm126_vm0 = vcmask 1041408   ;;  %v1072_v3 = vmov 0.0|0.0   ;;  %vm1073_vm1 = vmmov 1  }
   0x4   :  { %992 = vmatprep.subr.bf16.mxu0 %v1072_v3  ;;  %v1133_v4 = vpack.c.bf16 %v119_v2, %v118_v1  ;;  %vm1135_vm2 = vmpackc.low %vm126_vm0, %vm1073_vm1  ;;  %996 = vmatprep.subr.bf16.mxu1 %v1072_v3  ;;  %vm1074_vm3 = vmmov 0   ;;  %v1075_v6 = vmov 0.0   ;;  %v31_v7 = vld [vmem:[%s1280_s0] sm:$0x3]  ;;  %vm122_vm4 = vcmask 80896  }
   0x5   :  { %940 = vmatprep.mubr.msk.f32.mxu0 %vm1074_vm3, %v1075_v6  ;;  %947 = vmatprep.mubr.msk.f32.mxu1 %vm1074_vm3, %v1075_v6  ;;  %v120_v8 = vld [vmem:[%s1281_s1] sm:$0x3]  ;;  %v1076_v9 = vmov 0  }
   0x6   :  { %995 = vmatpush3.bf16.msk.msra.mxu0 %vm1135_vm2, %v1133_v4  ;;  %1030 = vset.pattern.permute.xlu0 %v1076_v9 }
   0x7   :  { %42 = vperm.xlu0 %1030, %v31_v7   ;;  %999 = vmatpush3.bf16.msk.msra.mxu1 %vm1135_vm2, %v1133_v4 }
   0x8   :  { %16 = vsyncpa [#allocation5], 0  ;;  %v32_v10 = vld [vmem:[%s1280_s0 + $0x2] sm:$0x3]  ;;  %1031 = vset.pattern.permute.xlu1 %v1076_v9  ;;  %1000 = vmatprep.subr.bf16.mxu0 %v1072_v3  ;;  %v35_v11 = vld [vmem:[%s1280_s0 + $0x8] sm:$0x3] }
   0x9   :  { %941 = vmatmul.mubr.msk.f32.vlgmr.msra.gmra.mrb[0].mxu0 %vm122_vm4, %v120_v8  ;;  %1004 = vmatprep.subr.bf16.mxu1 %v1072_v3  ;;  %v37_v12 = vld [vmem:[%s1280_s0 + $0xc] sm:$0x3]  ;;  %v892_v13 = vld [vmem:[%s1282_s2] ss:$0 sm:$0xff]  ;;  %vm109_vm5 = vcmask 74752  }
   0xa   :  { %1003 = vmatpush3.bf16.msk.msra.mxu0 %vm1135_vm2, %v1133_v4  ;;  %954 = vmatprep.mubr.msk.f32.mxu0 %vm1074_vm3, %v1075_v6  ;;  %v893_v14 = vld [vmem:[%s1284_s4] ss:$0 sm:$0xff]  ;;  %v33_v36 = vld [vmem:[%s1280_s0 + $0x4] sm:$0x3]  ;;  %v34_v37 = vld [vmem:[%s1280_s0 + $0x6] sm:$0x3] }
   0xb   :  { %47 = vperm.xlu0 %1030, %v32_v10   ;;  %1008 = vmatprep.subr.bf16.mxu0 %v1072_v3  ;;  %v1195_v32 = vld [vmem:[%s1285_s5] ss:$0 sm:$0xff]  ;;  %v36_v38 = vld [vmem:[%s1280_s0 + $0xa] sm:$0x3]  ;;  %v38_v39 = vld [vmem:[%s1280_s0 + $0xe] sm:$0x3] }
   0xc   :  { %52 = vperm.xlu1 %1031, %v33_v36   ;;  %s1077_s0 = smov [#allocation4]  }
   0xd   :  { %s882_s29 = sshll.u32 %s1077_s0, 4  ;;  %s883_s29 = int_to_ptr.vmem [resolvable:$true] %s882_s29 }
   0xe   :  { %s1048_s30 = scalar_lea.vmem %s883_s29, 32  ;;  %p1053_p1 = scmp.lt.s32.totalorder %s883_s29, %s883_s29 }
   0xf   :  { %62 = vperm.xlu0 %1030, %v35_v11   ;;  %p1049_p0 = scmp.ne.s32.totalorder %s883_s29, %s1048_s30  ;;  %p1054_p2 = scmp.lt.s32.totalorder %s1048_s30, %s1048_s30 }
  0x10   :  { %57 = vperm.xlu1 %1031, %v34_v37   ;;  %v911_v37 = vld [vmem:[#allocation3] ss:$0 sm:$0xff] }
  0x11   :  { %p1055_p3 = por %p1054_p2, %p1053_p1 }
  0x13   :  { %72 = vperm.xlu0 %1030, %v37_v12   ;;  %p1056_p4 = pnand %p1055_p3, %p1049_p0 }
  0x14   :  { %67 = vperm.xlu1 %1031, %v36_v38  }
  0x18   :  { %77 = vperm.xlu1 %1031, %v38_v39  }
  0x86   :  { %v43_v15 = vpop.permute.xlu0 %42 }
  0x87   :  { %v86_v16 = vmul.f32 %v892_v13, %v43_v15 }
  0x89   :  { %v101_v17 = vadd.f32 %v893_v14, %v86_v16 }
  0x8a   :  { %v48_v18 = vpop.permute.xlu0 %47 }
  0x8b   :  { %110 = vst.msk [vmem:[#allocation2] sm:$0x3] %vm109_vm5, %v101_v17  ;;  %v87_v19 = vmul.f32 %v892_v13, %v48_v18  ;;  %v53_v40 = vpop.permute.xlu1 %52 }
  0x8c   :  { %v88_v41 = vmul.f32 %v892_v13, %v53_v40 }
  0x8d   :  { %v102_v20 = vadd.f32 %v893_v14, %v87_v19 }
  0x8e   :  { %v63_v21 = vpop.permute.xlu0 %62  ;;  %v103_v42 = vadd.f32 %v893_v14, %v88_v41 }
  0x8f   :  { %111 = vst.msk [vmem:[#allocation2 + $0x2] sm:$0x3] %vm109_vm5, %v102_v20  ;;  %v90_v22 = vmul.f32 %v892_v13, %v63_v21  ;;  %v58_v43 = vpop.permute.xlu1 %57 }
  0x90   :  { %112 = vst.msk [vmem:[#allocation2 + $0x4] sm:$0x3] %vm109_vm5, %v103_v42  ;;  %v89_v44 = vmul.f32 %v892_v13, %v58_v43 }
  0x91   :  { %v105_v23 = vadd.f32 %v893_v14, %v90_v22 }
  0x92   :  { %v73_v24 = vpop.permute.xlu0 %72  ;;  %v121_v27 = vld [vmem:[#allocation2] sm:$0x3]  ;;  %v104_v45 = vadd.f32 %v893_v14, %v89_v44 }
  0x93   :  { %114 = vst.msk [vmem:[#allocation2 + $0x8] sm:$0x3] %vm109_vm5, %v105_v23  ;;  %v92_v25 = vmul.f32 %v892_v13, %v73_v24  ;;  %v68_v46 = vpop.permute.xlu1 %67 }
  0x94   :  { %113 = vst.msk [vmem:[#allocation2 + $0x6] sm:$0x3] %vm109_vm5, %v104_v45  ;;  %v91_v47 = vmul.f32 %v892_v13, %v68_v46 }
  0x95   :  { %v107_v26 = vadd.f32 %v893_v14, %v92_v25 }
  0x96   :  { %v106_v48 = vadd.f32 %v893_v14, %v91_v47  ;;  %v204_v52 = vld [vmem:[#allocation2 + $0x2] sm:$0x3] }
  0x97   :  { %116 = vst.msk [vmem:[#allocation2 + $0xc] sm:$0x3] %vm109_vm5, %v107_v26  ;;  %v78_v49 = vpop.permute.xlu1 %77  ;;  %v282_v60 = vld [vmem:[#allocation2 + $0x4] sm:$0x3] }
  0x98   :  { %115 = vst.msk [vmem:[#allocation2 + $0xa] sm:$0x3] %vm109_vm5, %v106_v48  ;;  %v93_v50 = vmul.f32 %v892_v13, %v78_v49 }
  0x9a   :  { %v108_v51 = vadd.f32 %v893_v14, %v93_v50  ;;  %v438_v15 = vld [vmem:[#allocation2 + $0x8] sm:$0x3] }
  0x9b   :  { %v360_v8 = vld [vmem:[#allocation2 + $0x6] sm:$0x3] }
  0x9c   :  { %117 = vst.msk [vmem:[#allocation2 + $0xe] sm:$0x3] %vm109_vm5, %v108_v51 }
  0x9f   :  { %v516_v23 = vld [vmem:[#allocation2 + $0xa] sm:$0x3] }
  0xa3   :  { %v672_v38 = vld [vmem:[#allocation2 + $0xe] sm:$0x3] }
  0xdc   :  { %v196_v28 = vpop.f32.mrb[0].mxu0 }
  0xdd   :  { %v200_v29 = vadd.f32 %v196_v28, %v121_v27  ;;  %v942_v30 = vpop.f32.mrb[1].mxu0  ;;  %v594_v28 = vld [vmem:[#allocation2 + $0xc] sm:$0x3] }
  0xdf   :  { %1032 = vtanh.f32 %v200_v29 }
  0xe9   :  { %v1033_v31 = vpop.eup %1032 }
  0xea   :  { %202 = vst.msk [vmem:[#allocation2] sm:$0x3] %vm109_vm5, %v1033_v31  ;;  %948 = vmatmul.mubr.msk.f32.vlgmr.msra.gmra.mrb[0].mxu1 %vm122_vm4, %v1033_v31 }
  0xeb   :  { %1007 = vmatpush3.bf16.msk.msra.mxu1 %vm1135_vm2, %v1133_v4  ;;  %961 = vmatprep.mubr.msk.f32.mxu1 %vm1074_vm3, %v1075_v6 }
  0xec   :  { %1012 = vmatprep.subr.bf16.mxu1 %v1072_v3 }
  0xf1   :  { %v750_v33 = vld [vmem:[#allocation2] sm:$0x3] }
  0xf2   :  { %v765_v34 = vmul.f32 %v1195_v32, %v750_v33 }
  0xf4   :  { %v773_v35 = vsel %vm109_vm5, %v765_v34, 0.0 }
  0xf5   :  { %774 = vadd.xlane.f32.xlu0 %v773_v35 }
 0x1bd   :  { %v274_v53 = vpop.f32.mrb[0].mxu1 }
 0x1be   :  { %v278_v54 = vadd.f32 %v274_v53, %v204_v52  ;;  %v949_v55 = vpop.f32.mrb[1].mxu1 }
 0x1c0   :  { %1034 = vtanh.f32 %v278_v54 }
 0x1ca   :  { %v1035_v56 = vpop.eup %1034 }
 0x1cb   :  { %280 = vst.msk [vmem:[#allocation2 + $0x2] sm:$0x3] %vm109_vm5, %v1035_v56  ;;  %955 = vmatmul.mubr.msk.f32.vlgmr.msra.gmra.mrb[2].mxu0 %vm122_vm4, %v1035_v56 }
 0x1cc   :  { %1011 = vmatpush3.bf16.msk.msra.mxu0 %vm1135_vm2, %v1133_v4  ;;  %968 = vmatprep.mubr.msk.f32.mxu0 %vm1074_vm3, %v1075_v6 }
 0x1cd   :  { %1016 = vmatprep.subr.bf16.mxu0 %v1072_v3 }
 0x1d2   :  { %v751_v57 = vld [vmem:[#allocation2 + $0x2] sm:$0x3] }
 0x1d3   :  { %v766_v58 = vmul.f32 %v1195_v32, %v751_v57 }
 0x1d5   :  { %v776_v59 = vsel %vm109_vm5, %v766_v58, 0.0 }
 0x1d6   :  { %777 = vadd.xlane.f32.xlu1 %v776_v59 }
 0x29e   :  { %v352_v61 = vpop.f32.mrb[2].mxu0 }
 0x29f   :  { %v356_v62 = vadd.f32 %v352_v61, %v282_v60  ;;  %v956_v63 = vpop.f32.mrb[3].mxu0 }
 0x2a1   :  { %1036 = vtanh.f32 %v356_v62 }
 0x2ab   :  { %v1037_v0 = vpop.eup %1036 }
 0x2ac   :  { %358 = vst.msk [vmem:[#allocation2 + $0x4] sm:$0x3] %vm109_vm5, %v1037_v0  ;;  %962 = vmatmul.mubr.msk.f32.vlgmr.msra.gmra.mrb[2].mxu1 %vm122_vm4, %v1037_v0 }
 0x2ad   :  { %1015 = vmatpush3.bf16.msk.msra.mxu1 %vm1135_vm2, %v1133_v4  ;;  %975 = vmatprep.mubr.msk.f32.mxu1 %vm1074_vm3, %v1075_v6 }
 0x2ae   :  { %1020 = vmatprep.subr.bf16.mxu1 %v1072_v3 }
 0x2b3   :  { %v752_v1 = vld [vmem:[#allocation2 + $0x4] sm:$0x3] }
 0x2b4   :  { %v767_v2 = vmul.f32 %v1195_v32, %v752_v1 }
 0x2b6   :  { %v779_v7 = vsel %vm109_vm5, %v767_v2, 0.0 }
 0x2b7   :  { %780 = vadd.xlane.f32.xlu0 %v779_v7 }
 0x37f   :  { %v430_v9 = vpop.f32.mrb[2].mxu1 }
 0x380   :  { %v434_v10 = vadd.f32 %v430_v9, %v360_v8  ;;  %v963_v11 = vpop.f32.mrb[3].mxu1 }
 0x382   :  { %1038 = vtanh.f32 %v434_v10 }
 0x38c   :  { %v1039_v12 = vpop.eup %1038 }
 0x38d   :  { %436 = vst.msk [vmem:[#allocation2 + $0x6] sm:$0x3] %vm109_vm5, %v1039_v12  ;;  %969 = vmatmul.mubr.msk.f32.vlgmr.msra.gmra.mrb[4].mxu0 %vm122_vm4, %v1039_v12 }
 0x38e   :  { %1019 = vmatpush3.bf16.msk.msra.mxu0 %vm1135_vm2, %v1133_v4  ;;  %982 = vmatprep.mubr.msk.f32.mxu0 %vm1074_vm3, %v1075_v6 }
 0x394   :  { %v753_v3 = vld [vmem:[#allocation2 + $0x6] sm:$0x3] }
 0x395   :  { %v768_v13 = vmul.f32 %v1195_v32, %v753_v3 }
 0x397   :  { %v782_v14 = vsel %vm109_vm5, %v768_v13, 0.0 }
 0x398   :  { %783 = vadd.xlane.f32.xlu0 %v782_v14 }
 0x460   :  { %v508_v16 = vpop.f32.mrb[4].mxu0 }
 0x461   :  { %v512_v17 = vadd.f32 %v508_v16, %v438_v15  ;;  %v970_v18 = vpop.f32.mrb[5].mxu0 }
 0x463   :  { %1040 = vtanh.f32 %v512_v17 }
 0x46d   :  { %v1041_v19 = vpop.eup %1040 }
 0x46e   :  { %514 = vst.msk [vmem:[#allocation2 + $0x8] sm:$0x3] %vm109_vm5, %v1041_v19  ;;  %976 = vmatmul.mubr.msk.f32.vlgmr.msra.gmra.mrb[4].mxu1 %vm122_vm4, %v1041_v19 }
 0x46f   :  { %1023 = vmatpush3.bf16.msk.msra.mxu1 %vm1135_vm2, %v1133_v4  ;;  %989 = vmatprep.mubr.msk.f32.mxu1 %vm1074_vm3, %v1075_v6 }
 0x475   :  { %v754_v20 = vld [vmem:[#allocation2 + $0x8] sm:$0x3] }
 0x476   :  { %v769_v21 = vmul.f32 %v1195_v32, %v754_v20 }
 0x478   :  { %v785_v22 = vsel %vm109_vm5, %v769_v21, 0.0 }
 0x479   :  { %786 = vadd.xlane.f32.xlu1 %v785_v22 }
 0x541   :  { %v586_v24 = vpop.f32.mrb[4].mxu1 }
 0x542   :  { %v590_v25 = vadd.f32 %v586_v24, %v516_v23  ;;  %v977_v26 = vpop.f32.mrb[5].mxu1 }
 0x544   :  { %1042 = vtanh.f32 %v590_v25 }
 0x54e   :  { %v1043_v27 = vpop.eup %1042 }
 0x54f   :  { %592 = vst.msk [vmem:[#allocation2 + $0xa] sm:$0x3] %vm109_vm5, %v1043_v27  ;;  %983 = vmatmul.mubr.msk.f32.vlgmr.msra.gmra.mrb[6].mxu0 %vm122_vm4, %v1043_v27 }
 0x556   :  { %v755_v4 = vld [vmem:[#allocation2 + $0xa] sm:$0x3] }
 0x557   :  { %v770_v5 = vmul.f32 %v1195_v32, %v755_v4 }
 0x559   :  { %v788_v6 = vsel %vm109_vm5, %v770_v5, 0.0 }
 0x55a   :  { %789 = vadd.xlane.f32.xlu0 %v788_v6 }
 0x622   :  { %v664_v29 = vpop.f32.mrb[6].mxu0 }
 0x623   :  { %v668_v30 = vadd.f32 %v664_v29, %v594_v28  ;;  %v984_v31 = vpop.f32.mrb[7].mxu0 }
 0x625   :  { %1044 = vtanh.f32 %v668_v30 }
 0x62f   :  { %v1045_v33 = vpop.eup %1044 }
 0x630   :  { %670 = vst.msk [vmem:[#allocation2 + $0xc] sm:$0x3] %vm109_vm5, %v1045_v33  ;;  %990 = vmatmul.mubr.msk.f32.vlgmr.msra.gmra.mrb[6].mxu1 %vm122_vm4, %v1045_v33 }
 0x637   :  { %v756_v34 = vld [vmem:[#allocation2 + $0xc] sm:$0x3] }
 0x638   :  { %v771_v35 = vmul.f32 %v1195_v32, %v756_v34 }
 0x63a   :  { %v791_v36 = vsel %vm109_vm5, %v771_v35, 0.0 }
 0x63b   :  { %792 = vadd.xlane.f32.xlu1 %v791_v36 }
 0x64c   :  { %804 = vperm.xlu1 %1031, %v911_v37  }
 0x703   :  { %v742_v39 = vpop.f32.mrb[6].mxu1 }
 0x704   :  { %v746_v40 = vadd.f32 %v742_v39, %v672_v38  ;;  %v991_v41 = vpop.f32.mrb[7].mxu1 }
 0x706   :  { %1046 = vtanh.f32 %v746_v40 }
 0x710   :  { %v1047_v42 = vpop.eup %1046 }
 0x711   :  { %748 = vst.msk [vmem:[#allocation2 + $0xe] sm:$0x3] %vm109_vm5, %v1047_v42  ;;  %749 = vst.msk [vmem:[#allocation4] sm:$0x3] %vm109_vm5, %v1047_v42 }
 0x718   :  { %v757_v43 = vld [vmem:[#allocation2 + $0xe] sm:$0x3] }
 0x719   :  { %v772_v44 = vmul.f32 %v1195_v32, %v757_v43 }
 0x71b   :  { %v794_v45 = vsel %vm109_vm5, %v772_v44, 0.0 }
 0x71c   :  { %795 = vadd.xlane.f32.xlu0 %v794_v45 }
 0x71d   :  { %1059 = shalt.err (!%p1056_p4)
}
 0x71e   :  { %s1060_s6 = scalar_lea.hbm %s1288_s8, 32 }
 0x71f   :  { %p1061_p5 = scmp.ne.s32.totalorder %s1288_s8, %s1060_s6  ;;  %p1064_p6 = scmp.lt.u32.totalorder %s1060_s6, %s1288_s8 }
 0x721   :  { %p1066_p7 = pnand %p1064_p6, %p1061_p5 }
 0x723   :  { %1069 = shalt.err (!%p1066_p7)
}
 0x724   :  { %885 = dma.vmem_to_hbm [thread:$0]  %s883_s29, 32, %s1288_s8, [#allocation5]   ;;  %v778_v32 = vpop.xlane.xlu1 %777  ;;  %v823_v48 = vlaneseq  ;;  %v775_v52 = vpop.xlane.xlu0 %774  ;;  %vm857_vm6 = vcmask 1041409   ;;  %vm859_vm7 = vcmask 1042434   ;;  %vm861_vm8 = vcmask 1043459  }
 0x725   :  { %vm863_vm9 = vcmask 1044484   ;;  %vm865_vm10 = vcmask 1045509   ;;  %vm867_vm11 = vcmask 1046534   ;;  %vm869_vm12 = vcmask 1047559  }
 0x726   :  { %v824_v49 = vand.u32 127, %v823_v48  ;;  %v826_v50 = vshrl.u32 %v823_v48, 7  ;;  %vm872_vm13 = vcmask 15360  }
 0x728   :  { %v787_v46 = vpop.xlane.xlu1 %786  ;;  %v827_v53 = vsub.s32 %v824_v49, %v826_v50  ;;  %v781_v56 = vpop.xlane.xlu0 %780 }
 0x72c   :  { %v793_v47 = vpop.xlane.xlu1 %792  ;;  %v784_v60 = vpop.xlane.xlu0 %783 }
 0x730   :  { %v805_v51 = vpop.permute.xlu1 %804  ;;  %v790_v7 = vpop.xlane.xlu0 %789 }
 0x731   :  { %v807_v54 = vadd.f32 %v805_v51, %v775_v52  ;;  %v808_v55 = vadd.f32 %v805_v51, %v778_v32  ;;  %v809_v57 = vadd.f32 %v805_v51, %v781_v56  ;;  %v810_v62 = vadd.f32 %v805_v51, %v784_v60 }
 0x732   :  { %v811_v0 = vadd.f32 %v805_v51, %v787_v46  ;;  %v812_v8 = vadd.f32 %v805_v51, %v790_v7  ;;  %v813_v11 = vadd.f32 %v805_v51, %v793_v47 }
 0x733   :  { %v828_v58 = vrot.slane %v807_v54, %v827_v53  ;;  %v832_v59 = vrot.slane %v808_v55, %v827_v53  ;;  %v836_v61 = vrot.slane %v809_v57, %v827_v53  ;;  %v840_v2 = vrot.slane %v810_v62, %v827_v53 }
 0x734   :  { %v844_v10 = vrot.slane %v811_v0, %v827_v53  ;;  %v848_v3 = vrot.slane %v812_v8, %v827_v53  ;;  %v852_v16 = vrot.slane %v813_v11, %v827_v53 }
 0x735   :  { %v858_v63 = vsel %vm857_vm6, %v832_v59, %v828_v58 }
 0x736   :  { %v860_v1 = vsel %vm859_vm7, %v836_v61, %v858_v63 }
 0x737   :  { %v862_v9 = vsel %vm861_vm8, %v840_v2, %v860_v1 }
 0x738   :  { %v864_v12 = vsel %vm863_vm9, %v844_v10, %v862_v9 }
 0x739   :  { %v866_v14 = vsel %vm865_vm10, %v848_v3, %v864_v12 }
 0x73a   :  { %v868_v18 = vsel %vm867_vm11, %v852_v16, %v866_v14 }
 0x7a9   :  { %v796_v13 = vpop.xlane.xlu0 %795 }
 0x7aa   :  { %v814_v15 = vadd.f32 %v805_v51, %v796_v13 }
 0x7ac   :  { %v856_v17 = vrot.slane %v814_v15, %v827_v53 }
 0x7ae   :  { %v870_v19 = vsel %vm869_vm12, %v856_v17, %v868_v18 }
 0x7af   :  { %873 = vst.msk [vmem:[%s1287_s7] sm:$0xff] %vm872_vm13, %v870_v19 }
 0x7b0   :  { %1070 = dma.done.wait [#allocation5], 32  }
 0x7b1   :  { %1071 = vsyncadd [#allocation5], 4294967264 }
 0x7b2   :  { %891 = vsyncpa [#allocation5], 1 }

</bundles_post_ra>
